<compile_context>
chip_gen: v6e
topology: v6e:2x2x1
jax: 0.10.0
libtpu: 0.0.40
codegen_flags: <defaults>
</compile_context>

<pallas_src>
import jax
import jax.numpy as jnp
from jax.experimental import pallas as pl
from jax.experimental.pallas import tpu as pltpu


def _make_sdpa_kernel(has_mask: bool, return_attn: bool, inv_temp: float):
    """Build a kernel for the (mask?, attn-output?) combination."""

    def kernel(*refs):
        q_ref, k_ref, v_ref = refs[0], refs[1], refs[2]
        mask_ref = refs[3] if has_mask else None
        out_start = 4 if has_mask else 3
        o_ref = refs[out_start]
        attn_ref = refs[out_start + 1] if return_attn else None

        # Fold 1/temperature into the small (tq, d_qk) tile rather than the
        # (tq, len_k) score matrix.  Stays in q's native dtype (weak promotion).
        q = q_ref[0] * inv_temp            # (tq, d_qk)
        k = k_ref[0]                       # (len_k, d_qk)
        v = v_ref[0]                       # (len_k, d_v)

        # scores = (q / T) @ k^T -> (tq, len_k), f32 accumulation on the MXU.
        s = jax.lax.dot_general(
            q, k, dimension_numbers=(((1,), (1,)), ((), ())),
            preferred_element_type=jnp.float32)

        if has_mask:
            # masked_fill(mask, -inf): use a large finite negative so partially
            # masked rows never hit (-inf) - (-inf) = NaN in the stable softmax.
            s = jnp.where(mask_ref[0] != 0, jnp.float32(-1e30), s)

        # Numerically stable softmax along the key axis (f32 epilogue).
        m = jnp.max(s, axis=-1, keepdims=True)
        e = jnp.exp(s - m)
        denom = jnp.sum(e, axis=-1, keepdims=True)
        p = e * pl.reciprocal(denom, approx=False)

        if return_attn:
            attn_ref[0] = p.astype(attn_ref.dtype)

        # output = attn @ v -> (tq, d_v); cast probabilities to v's dtype (MXU).
        out = jnp.dot(p.astype(v.dtype), v, preferred_element_type=jnp.float32)
        o_ref[0] = out.astype(o_ref.dtype)

    return kernel


def scaled_dot_product_attention(q, k, v, temperature, mask=None, *,
                                 return_attn=True, tq_max=256):
    """q: (bsz, len_q, d_qk); k: (bsz, len_k, d_qk); v: (bsz, len_k, d_v);
    mask: optional (bsz, len_q, len_k), nonzero/True = masked out.
    Returns (output (bsz, len_q, d_v), attn (bsz, len_q, len_k) or None)."""
    bsz, len_q, d_q = q.shape
    _, len_k, d_k = k.shape
    _, len_v, d_v = v.shape
    assert len_k == len_v and d_q == d_k

    inv_temp = 1.0 / float(temperature)

    # Long-key heuristic: shrink the q tile so the (tq, len_k) f32 score
    # intermediates and the double-buffered attn tile fit scoped VMEM (v7x: 64 MiB).
    if len_k >= 2048:
        tq_max = min(tq_max, 128)
    tq = len_q if len_q <= tq_max else tq_max   # full length when short

    grid = (bsz, pl.cdiv(len_q, tq))            # ragged last q-tile handled by Pallas

    q_spec = pl.BlockSpec((1, tq, d_q), lambda b, i: (b, i, 0))
    k_spec = pl.BlockSpec((1, len_k, d_k), lambda b, i: (b, 0, 0))
    v_spec = pl.BlockSpec((1, len_k, d_v), lambda b, i: (b, 0, 0))

    in_specs = [q_spec, k_spec, v_spec]
    args = [q, k, v]
    has_mask = mask is not None
    if has_mask:
        # int8 mask: 4x less DMA bandwidth / VMEM than f32.
        args.append(mask.astype(jnp.int8))
        in_specs.append(pl.BlockSpec((1, tq, len_k), lambda b, i: (b, i, 0)))

    out_shapes = [jax.ShapeDtypeStruct((bsz, len_q, d_v), q.dtype)]
    out_specs = [pl.BlockSpec((1, tq, d_v), lambda b, i: (b, i, 0))]
    if return_attn:
        out_shapes.append(jax.ShapeDtypeStruct((bsz, len_q, len_k), q.dtype))
        out_specs.append(pl.BlockSpec((1, tq, len_k), lambda b, i: (b, i, 0)))

    # Rough per-step working set (double-buffered blocks + f32 intermediates);
    # only raise the scoped-VMEM limit when the defaults would be too small.
    itemsize = q.dtype.itemsize
    vmem_est = 2 * itemsize * (tq * d_q + len_k * d_k + len_k * d_v + tq * d_v)
    if has_mask:
        vmem_est += 2 * tq * len_k                       # int8 mask
    if return_attn:
        vmem_est += 2 * itemsize * tq * len_k            # attn output tile
    vmem_est += 3 * 4 * tq * len_k                       # live f32 s/e/p
    cp_kwargs = dict(dimension_semantics=("parallel", "arbitrary"))
    if vmem_est > 24 * 1024 * 1024:
        cp_kwargs["vmem_limit_bytes"] = int(min(vmem_est * 5 // 4, 96 * 1024 * 1024))

    kern = _make_sdpa_kernel(has_mask, return_attn, inv_temp)

    results = pl.pallas_call(
        kern,
        out_shape=out_shapes,
        grid_spec=pltpu.PrefetchScalarGridSpec(
            num_scalar_prefetch=0,
            grid=grid,
            in_specs=in_specs,
            out_specs=out_specs,
        ),
        compiler_params=pltpu.CompilerParams(**cp_kwargs),
    )(*args)

    out = results[0]
    attn = results[1] if return_attn else None
    return out, attn


def _reference(q, k, v, temperature, mask=None):
    # Pure-JAX reference mirroring the PyTorch forward (eval mode).
    attn = jnp.einsum("bqd,bkd->bqk", q, k,
                      precision=jax.lax.Precision.HIGHEST) / temperature
    if mask is not None:
        attn = jnp.where(mask, -jnp.inf, attn)
    attn = jax.nn.softmax(attn, axis=-1)
    out = jnp.einsum("bqk,bkd->bqd", attn, v,
                     precision=jax.lax.Precision.HIGHEST)
    return out, attn


if __name__ == "__main__":
    bsz, len_q, len_k, d_qk, d_v = 2, 8, 12, 32, 48
    temperature = d_qk ** 0.5

    key = jax.random.PRNGKey(0)
    kq, kk, kv, km, kq2, km2 = jax.random.split(key, 6)
    q = jax.random.normal(kq, (bsz, len_q, d_qk), dtype=jnp.float32)
    k = jax.random.normal(kk, (bsz, len_k, d_qk), dtype=jnp.float32)
    v = jax.random.normal(kv, (bsz, len_k, d_v), dtype=jnp.float32)

    # --- no-mask path ---
    out, attn = scaled_dot_product_attention(q, k, v, temperature)
    out, attn = jax.block_until_ready((out, attn))
    ref_out, ref_attn = _reference(q, k, v, temperature)
    assert out.shape == (bsz, len_q, d_v) and attn.shape == (bsz, len_q, len_k)
    assert jnp.allclose(out, ref_out, atol=5e-4, rtol=5e-4), "output mismatch (no mask)"
    assert jnp.allclose(attn, ref_attn, atol=5e-4, rtol=5e-4), "attn mismatch (no mask)"

    # --- masked path (ensure every row keeps at least one unmasked key) ---
    mask = jax.random.bernoulli(km, 0.3, (bsz, len_q, len_k))
    mask = mask.at[..., 0].set(False)
    out_m, attn_m = scaled_dot_product_attention(q, k, v, temperature, mask=mask)
    out_m, attn_m = jax.block_until_ready((out_m, attn_m))
    ref_out_m, ref_attn_m = _reference(q, k, v, temperature, mask=mask)
    assert jnp.allclose(out_m, ref_out_m, atol=5e-4, rtol=5e-4), "output mismatch (mask)"
    assert jnp.allclose(attn_m, ref_attn_m, atol=5e-4, rtol=5e-4), "attn mismatch (mask)"

    # --- ragged q-tile path (len_q not divisible by tq; no pad/slice copies) ---
    len_q2 = 300
    q2 = jax.random.normal(kq2, (bsz, len_q2, d_qk), dtype=jnp.float32)
    mask2 = jax.random.bernoulli(km2, 0.3, (bsz, len_q2, len_k))
    mask2 = mask2.at[..., 0].set(False)
    out2, attn2 = scaled_dot_product_attention(q2, k, v, temperature, mask=mask2)
    out2, attn2 = jax.block_until_ready((out2, attn2))
    ref_out2, ref_attn2 = _reference(q2, k, v, temperature, mask=mask2)
    assert out2.shape == (bsz, len_q2, d_v) and attn2.shape == (bsz, len_q2, len_k)
    assert jnp.allclose(out2, ref_out2, atol=5e-4, rtol=5e-4), "output mismatch (ragged)"
    assert jnp.allclose(attn2, ref_attn2, atol=5e-4, rtol=5e-4), "attn mismatch (ragged)"

    # --- attn-output-skipped fast path ---
    out_only, attn_none = scaled_dot_product_attention(q, k, v, temperature,
                                                       return_attn=False)
    out_only = jax.block_until_ready(out_only)
    assert attn_none is None
    assert jnp.allclose(out_only, ref_out, atol=5e-4, rtol=5e-4), "output mismatch (no attn)"

    print("KERNEL_OK")
</pallas_src>

<mosaic_0001>
module attributes {stable_mosaic.version = 11 : i64} {
  func.func @kernel(%arg0: i32, %arg1: i32, %arg2: memref<1x8x32xf32, #tpu.memory_space<vmem>>, %arg3: memref<1x12x32xf32, #tpu.memory_space<vmem>>, %arg4: memref<1x12x48xf32, #tpu.memory_space<vmem>>, %arg5: memref<1x8x48xf32, #tpu.memory_space<vmem>>, %arg6: memref<1x8x12xf32, #tpu.memory_space<vmem>>) attributes {dimension_semantics = [#tpu.dimension_semantics<parallel>, #tpu.dimension_semantics<arbitrary>], iteration_bounds = array<i64: 2, 1>, scalar_prefetch = 0 : i64, scratch_operands = 0 : i64, tpu.core_type = #tpu.core_type<tc>, window_params = [{transform_indices = @transform_0, window_bounds = array<i64: 1, 8, 32>}, {transform_indices = @transform_1, window_bounds = array<i64: 1, 12, 32>}, {transform_indices = @transform_2, window_bounds = array<i64: 1, 12, 48>}, {transform_indices = @transform_3, window_bounds = array<i64: 1, 8, 48>}, {transform_indices = @transform_4, window_bounds = array<i64: 1, 8, 12>}]} {
    %c0 = arith.constant 0 : index
    %c0_0 = arith.constant 0 : index
    %c0_1 = arith.constant 0 : index
    %0 = vector.load %arg2[%c0, %c0_0, %c0_1] : memref<1x8x32xf32, #tpu.memory_space<vmem>>, vector<1x8x32xf32>
    %1 = vector.shape_cast %0 : vector<1x8x32xf32> to vector<8x32xf32>
    %cst = arith.constant 0.176776692 : f32
    %2 = vector.broadcast %cst : f32 to vector<8x32xf32>
    %3 = arith.mulf %1, %2 : vector<8x32xf32>
    %c0_2 = arith.constant 0 : index
    %c0_3 = arith.constant 0 : index
    %c0_4 = arith.constant 0 : index
    %4 = vector.load %arg3[%c0_2, %c0_3, %c0_4] : memref<1x12x32xf32, #tpu.memory_space<vmem>>, vector<1x12x32xf32>
    %5 = vector.shape_cast %4 : vector<1x12x32xf32> to vector<12x32xf32>
    %c0_5 = arith.constant 0 : index
    %c0_6 = arith.constant 0 : index
    %c0_7 = arith.constant 0 : index
    %6 = vector.load %arg4[%c0_5, %c0_6, %c0_7] : memref<1x12x48xf32, #tpu.memory_space<vmem>>, vector<1x12x48xf32>
    %7 = vector.shape_cast %6 : vector<1x12x48xf32> to vector<12x48xf32>
    %cst_8 = arith.constant dense<0.000000e+00> : vector<8x12xf32>
    %8 = tpu.matmul %3, %5, %cst_8 {dimension_numbers = #tpu.dot_dimension_numbers<[1], [1], [0], [0], [0, 0, 1, 0], [], []>} : vector<8x32xf32>, vector<12x32xf32>, vector<8x12xf32> -> vector<8x12xf32>
    %cst_9 = arith.constant dense<0xFF800000> : vector<8xf32>
    %9 = vector.multi_reduction <maximumf>, %8, %cst_9 [1] : vector<8x12xf32> to vector<8xf32>
    %10 = vector.shape_cast %9 : vector<8xf32> to vector<8x1xf32>
    %11 = vector.broadcast %10 : vector<8x1xf32> to vector<8x12xf32>
    %12 = arith.subf %8, %11 : vector<8x12xf32>
    %13 = math.exp %12 : vector<8x12xf32>
    %cst_10 = arith.constant dense<0.000000e+00> : vector<8xf32>
    %14 = vector.multi_reduction <add>, %13, %cst_10 [1] : vector<8x12xf32> to vector<8xf32>
    %15 = vector.shape_cast %14 : vector<8xf32> to vector<8x1xf32>
    %16 = tpu.reciprocal %15 : vector<8x1xf32> -> vector<8x1xf32>
    %17 = vector.broadcast %16 : vector<8x1xf32> to vector<8x12xf32>
    %18 = arith.mulf %13, %17 : vector<8x12xf32>
    %c0_11 = arith.constant 0 : index
    %c0_12 = arith.constant 0 : index
    %c0_13 = arith.constant 0 : index
    %19 = vector.load %arg6[%c0_11, %c0_12, %c0_13] : memref<1x8x12xf32, #tpu.memory_space<vmem>>, vector<1x8x12xf32>
    %20 = vector.shape_cast %19 : vector<1x8x12xf32> to vector<8x12xf32>
    %21 = vector.shape_cast %18 : vector<8x12xf32> to vector<1x8x12xf32>
    tpu.vector_store %arg6[%c0_11, %c0_12, %c0_13], %21 {strides = array<i32>} : memref<1x8x12xf32, #tpu.memory_space<vmem>>, vector<1x8x12xf32>,
    %cst_14 = arith.constant dense<0.000000e+00> : vector<8x48xf32>
    %22 = tpu.matmul %18, %7, %cst_14 {dimension_numbers = #tpu.dot_dimension_numbers<[1], [0], [0], [1], [0, 0, 1, 1], [], []>} : vector<8x12xf32>, vector<12x48xf32>, vector<8x48xf32> -> vector<8x48xf32>
    %c0_15 = arith.constant 0 : index
    %c0_16 = arith.constant 0 : index
    %c0_17 = arith.constant 0 : index
    %23 = vector.load %arg5[%c0_15, %c0_16, %c0_17] : memref<1x8x48xf32, #tpu.memory_space<vmem>>, vector<1x8x48xf32>
    %24 = vector.shape_cast %23 : vector<1x8x48xf32> to vector<8x48xf32>
    %25 = vector.shape_cast %22 : vector<8x48xf32> to vector<1x8x48xf32>
    tpu.vector_store %arg5[%c0_15, %c0_16, %c0_17], %25 {strides = array<i32>} : memref<1x8x48xf32, #tpu.memory_space<vmem>>, vector<1x8x48xf32>,
    return
  }
  func.func @transform_0(%arg0: i32, %arg1: i32) -> (i32, i32, i32) {
    %c0_i32 = arith.constant 0 : i32
    %c0_i32_0 = arith.constant 0 : i32
    return %arg0, %arg1, %c0_i32 : i32, i32, i32
  }
  func.func @transform_1(%arg0: i32, %arg1: i32) -> (i32, i32, i32) {
    %c0_i32 = arith.constant 0 : i32
    %c0_i32_0 = arith.constant 0 : i32
    %c0_i32_1 = arith.constant 0 : i32
    return %arg0, %c0_i32, %c0_i32_0 : i32, i32, i32
  }
  func.func @transform_2(%arg0: i32, %arg1: i32) -> (i32, i32, i32) {
    %c0_i32 = arith.constant 0 : i32
    %c0_i32_0 = arith.constant 0 : i32
    %c0_i32_1 = arith.constant 0 : i32
    return %arg0, %c0_i32, %c0_i32_0 : i32, i32, i32
  }
  func.func @transform_3(%arg0: i32, %arg1: i32) -> (i32, i32, i32) {
    %c0_i32 = arith.constant 0 : i32
    %c0_i32_0 = arith.constant 0 : i32
    return %arg0, %arg1, %c0_i32 : i32, i32, i32
  }
  func.func @transform_4(%arg0: i32, %arg1: i32) -> (i32, i32, i32) {
    %c0_i32 = arith.constant 0 : i32
    %c0_i32_0 = arith.constant 0 : i32
    return %arg0, %arg1, %c0_i32 : i32, i32, i32
  }
}

</mosaic_0001>

<bundles_post_ra>
// kernel: tpu_custom_call.1
= control target key start
LH: loop header
LB: loop body
LE: loop exit
PB: predicated region body
PF: predicated region fallthrough
CT: control target
= control target key end

     0   :  { %10 = vsyncpa [#allocation3], 0  ;;  %s1012_s0 = inlined_call_operand.vmem [shape: f32[2,8,32], index: 0, kind: input, shape index: {}]   ;;  %s1013_s1 = inlined_call_operand.vmem [shape: f32[2,12,32], index: 1, kind: input, shape index: {}]   ;;  %s1014_s2 = inlined_call_operand.vmem [shape: f32[2,12,48], index: 2, kind: input, shape index: {}]   ;;  %s1015_s3 = inlined_call_operand.hbm [shape: f32[2,8,48], index: 3, kind: output, shape index: {0}]   ;;  %s1016_s4 = inlined_call_operand.hbm [shape: f32[2,8,12], index: 4, kind: output, shape index: {1}]  }
   0x1   :  { %12 = vsyncpa [#allocation3 + $0x1], 0 }
   0x2   :  { %13 = vsyncpa [#allocation5], 0 }
   0x3   :  { %15 = vsyncpa [#allocation5 + $0x1], 0  ;;  %s859_s15 = smov 0   ;;  %s861_s16 = smov 0  }
   0x4   :  { %s863_s17 = smov 0   ;;  %s865_s18 = smov 0  }
   0x5   :  { %s867_s19 = smov 0   ;;  %s869_s20 = smov 0  }
   0x6 LB: > { %s611_s21 = sadd.s32 4294967295, %s828_s20   ;;  %s612_s22 = sadd.s32 4294967294, %s828_s20   ;;  %s828_s20 = sphi %s869_s20, %s21_s20   ;;  %s824_s19 = sphi %s867_s19, %s1023_s19   ;;  %s820_s18 = sphi %s865_s18, %s1022_s18   ;;  %s816_s17 = sphi %s863_s17, %s1021_s17   ;;  %s812_s16 = sphi %s861_s16, %s1020_s16   ;;  %s808_s15 = sphi %s859_s15, %s1019_s15  }
   0x7   : > { %s33_s23 = sadd.s32 1, %s824_s19  ;;  %s122_s24 = sadd.s32 1, %s816_s17 }
   0x8   : > { %p35_p0 = scmp.ge.s32.totalorder %s33_s23, 2  ;;  %p132_p1 = scmp.ne.s32.totalorder %s816_s17, %s812_s16 }
   0x9   : > { %p133_p2 = scmp.eq.s32.totalorder %s611_s21, 1  ;;  %p138_p3 = scmp.ne.s32.totalorder %s812_s16, %s808_s15 }
   0xa   : > { %s1025_s23 = smov (%p35_p0, %s33_s23), 0  ;;  %p139_p5 = scmp.eq.s32.totalorder %s612_s22, 1 }
   0xb   : > { %p899_p4 = por %p133_p2, %p132_p1  ;;  %s117_s26 = ssub.s32 %s824_s19, %s1025_s23 }
   0xc   : > { %p615_p6 = scmp.ge.s32.totalorder %s828_s20, 1  ;;  %p120_p7 = scmp.eq.s32.totalorder %s117_s26, 0 }
   0xd   : > { %p906_p8 = por %p139_p5, %p138_p3  ;;  %p211_p9 = scmp.lt.s32.totalorder %s828_s20, 3 }
   0xe   : > { %s912_s28 = scalar_select %p120_p7, %s816_s17, %s122_s24  }
   0xf   : > { %p212_p10 = pnand %p615_p6, %p211_p9 }
  0x10   : > { %p254_p11 = scmp.lt.s32.totalorder (!%p212_p10), %s820_s18, 1  ;;  %s932_s21 = sand.u32 (!%p212_p10), 1, %s812_s16  }
  0x11   : > { %215 = sbr.rel (%p212_p10) target bundleno = 746 (0x2ea), region = 32  ;;  %s616_s22 = sshll.u32 (!%p212_p10), %s932_s21, 3 }
  0x12   : > { %s253_s24 = scalar_lea.vmem (!%p212_p10), [#allocation4], %s616_s22  ;;  %s630_s26 = sshll.u32 (!%p212_p10), %s820_s18, 7 }
  0x13   : > { %s483_s6 = sshll.u32 (!%p212_p10), %s253_s24, 4  ;;  %s455_s7 = scalar_lea.sflag (!%p212_p10), [#allocation5], %s932_s21  ;;  %s484_s6 = int_to_ptr.vmem [resolvable:$true] %s483_s6 }
  0x14   : > { %s832_s9 = smov (!%p212_p10), [#allocation4]  }
  0x15   : > { %s726_s10 = sshll.u32 (!%p212_p10), %s832_s9, 4  ;;  %s727_s10 = int_to_ptr.vmem [resolvable:$false] %s726_s10 }
  0x16   : > { %v830_v0 = vmov 0.0   ;;  %vm831_vm0 = vmmov 0   ;;  %s916_s29 = scalar_select %p254_p11, %s820_s18, 1  ;;  %vm277_vm1 = vcmask 261120   ;;  %vm357_vm2 = vcmask 97280  }
  0x17   : > { %642 = vmatprep.subr.mxu0 %v830_v0  ;;  %646 = vmatprep.mubr.msk.f32.mxu0 %vm831_vm0, %v830_v0  ;;  %vm373_vm3 = vcmask 1043456   ;;  %p729_p1 = scmp.lt.s32.totalorder %s484_s6, %s727_s10 }
  0x18   : > { %649 = vmatprep.subr.mxu1 %v830_v0  ;;  %653 = vmatprep.mubr.msk.f32.mxu1 %vm831_vm0, %v830_v0  ;;  %s618_s30 = sshll.u32 %s916_s29, 3  ;;  %s634_s5 = sshll.u32 %s916_s29, 4 }
  0x19   : > { %s265_s8 = scalar_lea.vmem %s1013_s1, %s634_s5  ;;  %s260_s11 = scalar_lea.vmem %s1012_s0, %s618_s30 }
  0x1a   : > { %v274_v1 = vld [vmem:[%s265_s8 + $0x8] sm:$0xf]  ;;  %v271_v2 = vld [vmem:[%s260_s11] sm:$0xff]  ;;  %s270_s14 = scalar_lea.vmem %s1014_s2, %s634_s5  ;;  %s481_s5 = scalar_lea.hbm %s1016_s4, %s630_s26 }
  0x1b   : > { %643 = vmatpush3.xpose.msk.msra.mxu0 %vm277_vm1, %v274_v1  ;;  %v273_v3 = vld [vmem:[%s265_s8] sm:$0xff]  ;;  %v272_v4 = vmul.f32 0.17677669, %v271_v2  ;;  %v276_v13 = vld [vmem:[%s270_s14 + $0x8] sm:$0xf]  ;;  %s722_s8 = scalar_lea.vmem %s484_s6, 128 }
  0x1c   : > { %644 = vmatprep.subr.mxu0 %v830_v0  ;;  %v275_v14 = vld [vmem:[%s270_s14] sm:$0xff]  ;;  %650 = vmatpush3.msk.msra.mxu1 %vm373_vm3, %v276_v13  ;;  %p723_p12 = scmp.ne.s32.totalorder %s484_s6, %s722_s8  ;;  %s728_s11 = scalar_lea.vmem %s727_s10, 256 }
  0x1d   : > { %651 = vmatprep.subr.mxu1 %v830_v0  ;;  %p730_p2 = scmp.lt.s32.totalorder %s728_s11, %s722_s8 }
  0x1e   : > { %652 = vmatpush3.msra.mxu1 %v275_v14  ;;  %p724_p13 = pnand %p723_p12, %p899_p4 }
  0x1f   : > { %645 = vmatpush3.xpose.msk.msra.mxu0 %vm277_vm1, %v273_v3  ;;  %p731_p3 = por %p730_p2, %p729_p1 }
  0x20   : > { %p725_p0 = pneg %p724_p13 }
  0x22   : > { %647 = vmatmul.mubr.msk.f32.vlgmr.msra.gmra.mxu0 %vm277_vm1, %v272_v4  ;;  %p732_p5 = pnand %p731_p3, %p725_p0 }
  0xe2   : > { %v353_v5 = vpop.f32.mrf.mxu0 }
  0xe3   : > { %v358_v6 = vsel %vm357_vm2, %v353_v5, -inf }
  0xe4   : > { %359 = vmax.xlane.f32.xlu0 %v358_v6  ;;  %v648_v7 = vpop.f32.mrf.mxu0 }
 0x16d   : > { %v360_v8 = vpop.xlane.xlu0 %359 }
 0x16e   : > { %v361_v9 = vsub.f32 %v353_v5, %v360_v8 }
 0x170   : > { %v362_v10 = vmul.f32 1.442695, %v361_v9 }
 0x172   : > { %718 = vpow2.f32 %v362_v10 }
 0x17f   : > { %v719_v11 = vpop.eup %718 }
 0x180   : > { %v364_v12 = vsel %vm357_vm2, %v719_v11, 0.0 }
 0x181   : > { %365 = vadd.xlane.f32.xlu0 %v364_v12 }
 0x20a   : > { %v366_v15 = vpop.xlane.xlu0 %365 }
 0x20b   : > { %720 = vrcp.f32 %v366_v15 }
 0x218   : > { %v721_v16 = vpop.eup %720 }
 0x219   : > { %v368_v17 = vmul.f32 %v721_v16, %v719_v11 }
 0x21b   : > { %654 = vmatmul.mubr.msk.f32.vlgmr.msra.gmra.mxu1 %vm357_vm2, %v368_v17  ;;  %369 = vst.msk [vmem:[%s253_s24] sm:$0xff] %vm357_vm2, %v368_v17 }
 0x21c   : > { %735 = shalt.err (!%p732_p5)
}
 0x21d   : > { %s736_s12 = scalar_lea.hbm %s481_s5, 128  ;;  %s740_s24 = scalar_lea.hbm %s1016_s4, 256 }
 0x21e   : > { %p737_p6 = scmp.ne.s32.totalorder %s481_s5, %s736_s12  ;;  %p741_p10 = scmp.lt.s32.totalorder %s481_s5, %s1016_s4 }
 0x21f   : > { %p742_p11 = scmp.lt.s32.totalorder %s740_s24, %s736_s12 }
 0x220   : > { %p738_p7 = pnand %p737_p6, %p899_p4 }
 0x221   : > { %p743_p12 = por %p742_p11, %p741_p10 }
 0x222   : > { %p739_p9 = pneg %p738_p7 }
 0x224   : > { %p744_p13 = pnand %p743_p12, %p739_p9 }
 0x226   : > { %747 = shalt.err (!%p744_p13)
}
 0x227   : > { %657 = dma.vmem_to_hbm [thread:$0]  (%p899_p4), %s484_s6, 128, %s481_s5, %s455_s7   ;;  %vm447_vm4 = vcmask 392192  }
 0x228   : > { %s246_s8 = scalar_lea.vmem [#allocation2], %s616_s22  ;;  %s965_s13 = scalar_lea.hbm %s1015_s3, %s630_s26 }
 0x229   : > { %s469_s9 = sshll.u32 %s246_s8, 4  ;;  %s450_s12 = scalar_lea.sflag [#allocation3], %s932_s21  ;;  %s967_s9 = int_to_ptr.vmem [resolvable:$true] %s469_s9 }
 0x22a   : > { %s748_s5 = scalar_lea.vmem %s967_s9, 128  ;;  %s833_s18 = smov [#allocation2]  }
 0x22b   : > { %p749_p0 = scmp.ne.s32.totalorder %s967_s9, %s748_s5  ;;  %s752_s22 = sshll.u32 %s833_s18, 4  ;;  %s753_s22 = int_to_ptr.vmem [resolvable:$false] %s752_s22 }
 0x22c   : > { %s754_s6 = scalar_lea.vmem %s753_s22, 256  ;;  %p755_p3 = scmp.lt.s32.totalorder %s967_s9, %s753_s22 }
 0x22d   : > { %p750_p1 = pnand %p749_p0, %p899_p4  ;;  %p756_p5 = scmp.lt.s32.totalorder %s754_s6, %s748_s5 }
 0x22f   : > { %p751_p2 = pneg %p750_p1  ;;  %p757_p6 = por %p756_p5, %p755_p3 }
 0x231   : > { %p758_p7 = pnand %p757_p6, %p751_p2 }
 0x2db   : > { %v443_v18 = vpop.f32.mrf.mxu1 }
 0x2dc   : > { %448 = vst.msk [vmem:[%s246_s8] sm:$0xff] %vm447_vm4, %v443_v18 }
 0x2dd   : > { %v655_v19 = vpop.f32.mrf.mxu1 }
 0x2de   : > { %761 = shalt.err (!%p758_p7)
}
 0x2df   : > { %s762_s26 = scalar_lea.hbm %s965_s13, 128  ;;  %s766_s14 = scalar_lea.hbm %s1015_s3, 256 }
 0x2e0   : > { %p763_p9 = scmp.ne.s32.totalorder %s965_s13, %s762_s26  ;;  %p767_p12 = scmp.lt.s32.totalorder %s965_s13, %s1015_s3 }
 0x2e1   : > { %p768_p13 = scmp.lt.s32.totalorder %s766_s14, %s762_s26 }
 0x2e2   : > { %p764_p10 = pnand %p763_p9, %p899_p4 }
 0x2e3   : > { %p769_p0 = por %p768_p13, %p767_p12 }
 0x2e4   : > { %p765_p11 = pneg %p764_p10 }
 0x2e6   : > { %p770_p1 = pnand %p769_p0, %p765_p11 }
 0x2e8   : > { %773 = shalt.err (!%p770_p1)
}
 0x2e9   : > { %656 = dma.vmem_to_hbm [thread:$0]  (%p899_p4), %s967_s9, 128, %s965_s13, %s450_s12  }
 0x2ea PF: > { %p667_p2 = scmp.ge.s32.totalorder %s828_s20, 2  ;;  %s495_s30 = sand.u32 1, %s808_s15  }
 0x2eb   : > { %s496_s8 = scalar_lea.sflag [#allocation3], %s495_s30 }
 0x2ec   : > { %p661_p3 = pnand %p667_p2, %p906_p8 }
 0x2ee   : > { %p662_p5 = pneg %p661_p3 }
 0x2f0   : > { %799 = dma.done.wait (%p662_p5), %s496_s8, 128  }
 0x2f1   : > { %801 = vsyncadd (%p662_p5), %s496_s8, 4294967168  ;;  %s505_s10 = scalar_lea.sflag [#allocation5], %s495_s30 }
 0x2f2   : > { %803 = dma.done.wait (%p662_p5), %s505_s10, 128  }
 0x2f3   : > { %805 = vsyncadd (%p662_p5), %s505_s10, 4294967168  ;;  %s21_s20 = sadd.s32 1, %s828_s20   ;;  %s1019_s15 = smov %s812_s16 }
 0x2f4   : > { %p18_p6 = scmp.ge.s32.totalorder %s21_s20, 4   ;;  %s1020_s16 = smov %s816_s17 }
 0x2f5   : > { %s1021_s17 = smov %s912_s28  ;;  %s1022_s18 = smov %s824_s19 }
 0x2f6   : > { %s1023_s19 = smov %s1025_s23  ;;  %20 = sbr.rel (!%p18_p6) target bundleno = 6 (0x6), region = 90 }
 0x2fb   :  { %510 = vsyncpa [#allocation3], 1 }
 0x2fc   :  { %512 = vsyncpa [#allocation3 + $0x1], 1 }
 0x2fd   :  { %513 = vsyncpa [#allocation5], 1 }
 0x2fe   :  { %515 = vsyncpa [#allocation5 + $0x1], 1 }

</bundles_post_ra>
